<compile_context>
chip_gen: v7x
topology: tpu7x:2x2x1
jax: 0.10.0
libtpu: 0.0.40
codegen_flags: <defaults>
</compile_context>

<pallas_src>
import jax
import jax.numpy as jnp
from jax.experimental import pallas as pl
from jax.experimental.pallas import tpu as pltpu

LANE = 128


def _round_up(n, m):
    return ((n + m - 1) // m) * m


def _dqn_kernel(x_ref, w1_ref, b1_ref, w2_ref, b2_ref, w3_ref, b3_ref, o_ref):
    # x / weights are bf16; all matmuls accumulate in f32 on the MXU,
    # biases are f32 and added to the f32 accumulators.
    x = x_ref[...]                                                     # (tb, S) bf16
    h1 = jnp.dot(x, w1_ref[...], preferred_element_type=jnp.float32) + b1_ref[...]
    h1 = jnp.maximum(h1, 0.0).astype(jnp.bfloat16)                     # ReLU, bf16 for next MXU op
    h2 = jnp.dot(h1, w2_ref[...], preferred_element_type=jnp.float32) + b2_ref[...]
    h2 = jnp.maximum(h2, 0.0).astype(jnp.bfloat16)                     # ReLU
    out = jnp.dot(h2, w3_ref[...], preferred_element_type=jnp.float32) + b3_ref[...]
    o_ref[...] = out                                                   # (tb, A_pad) f32, lane-dense store


@jax.jit
def dqn_forward(x, w1, b1, w2, b2, w3, b3):
    """Fused DQN forward. x: (B, S) any float dtype; weights (in, out); biases (1, out)."""
    B, S = x.shape
    H = w1.shape[1]
    A = w3.shape[1]

    # Batch tiling: big tiles amortize the ~0.35us per-grid-step overhead; for
    # large batches keep 128-row tiles so the grid has multiple "parallel"
    # steps (megacore / v7x 2-TC sharding).
    if B <= 128:
        block_b = _round_up(B, 8)
    else:
        block_b = 128
    B_pad = _round_up(B, block_b)

    # Lane-dense fc3 output: pad out-features to a full 128-lane width so the
    # output store is an unmasked vst, then slice back in the wrapper.
    A_pad = _round_up(A, LANE)

    x_p = jnp.pad(x.astype(jnp.bfloat16), ((0, B_pad - B), (0, 0)))
    w1_b = w1.astype(jnp.bfloat16)
    w2_b = w2.astype(jnp.bfloat16)
    w3_b = jnp.pad(w3, ((0, 0), (0, A_pad - A))).astype(jnp.bfloat16)
    b1_f = b1.astype(jnp.float32)
    b2_f = b2.astype(jnp.float32)
    b3_p = jnp.pad(b3.astype(jnp.float32), ((0, 0), (0, A_pad - A)))

    grid = (B_pad // block_b,)

    cost = pl.CostEstimate(
        flops=2 * B_pad * (S * H + H * H + H * A_pad),
        transcendentals=0,
        bytes_accessed=(
            B_pad * S * 2                                  # x (bf16)
            + (S * H + H * H + H * A_pad) * 2              # weights (bf16)
            + (H + H + A_pad) * 4                          # biases (f32)
            + B_pad * A_pad * 4                            # output (f32)
        ),
    )

    # Weight/bias index_maps are constant across the grid, so their tiles stay
    # resident in VMEM (no re-DMA per batch tile). Weights are tiny at H=128;
    # if H is ever scaled to >=4k, tile fc2's K dim with an accumulator
    # instead of keeping the full (H, H) block resident (v7x VMEM = 64 MiB).
    out = pl.pallas_call(
        _dqn_kernel,
        out_shape=jax.ShapeDtypeStruct((B_pad, A_pad), jnp.float32),
        grid_spec=pltpu.PrefetchScalarGridSpec(
            num_scalar_prefetch=0,
            grid=grid,
            in_specs=[
                pl.BlockSpec((block_b, S), lambda i: (i, 0)),    # x tile (bf16)
                pl.BlockSpec((S, H), lambda i: (0, 0)),          # fc1 weight (full, bf16)
                pl.BlockSpec((1, H), lambda i: (0, 0)),          # fc1 bias (f32)
                pl.BlockSpec((H, H), lambda i: (0, 0)),          # fc2 weight (full, bf16)
                pl.BlockSpec((1, H), lambda i: (0, 0)),          # fc2 bias (f32)
                pl.BlockSpec((H, A_pad), lambda i: (0, 0)),      # fc3 weight (lane-padded, bf16)
                pl.BlockSpec((1, A_pad), lambda i: (0, 0)),      # fc3 bias (lane-padded, f32)
            ],
            out_specs=pl.BlockSpec((block_b, A_pad), lambda i: (i, 0)),
        ),
        compiler_params=pltpu.CompilerParams(
            dimension_semantics=("parallel",),
        ),
        cost_estimate=cost,
    )(x_p, w1_b, b1_f, w2_b, b2_f, w3_b, b3_p)

    return out[:B, :A]


def init_dqn_params(key, state_size, action_size, hidden_size=128):
    """Deterministic init mimicking PyTorch nn.Linear default U[-1/sqrt(fan_in), 1/sqrt(fan_in)].

    Weights are returned in (in_features, out_features) layout; biases as (1, out).
    """
    ks = jax.random.split(key, 6)

    def linear(kw, kb, fan_in, fan_out):
        bound = 1.0 / jnp.sqrt(jnp.float32(fan_in))
        w = jax.random.uniform(kw, (fan_in, fan_out), jnp.float32, -bound, bound)
        b = jax.random.uniform(kb, (1, fan_out), jnp.float32, -bound, bound)
        return w, b

    w1, b1 = linear(ks[0], ks[1], state_size, hidden_size)
    w2, b2 = linear(ks[2], ks[3], hidden_size, hidden_size)
    w3, b3 = linear(ks[4], ks[5], hidden_size, action_size)
    return w1, b1, w2, b2, w3, b3


if __name__ == "__main__":
    key = jax.random.PRNGKey(0)
    k_in, k_params = jax.random.split(key)

    batch = 8
    state_size = 16
    action_size = 4
    hidden_size = 128

    x = jax.random.normal(k_in, (batch, state_size), dtype=jnp.float32)
    params = init_dqn_params(k_params, state_size, action_size, hidden_size)

    out = dqn_forward(x, *params)
    out = jax.block_until_ready(out)

    # Pure-JAX f32 reference of the same forward pass (kernel uses bf16
    # inputs/weights with f32 accumulation, so use a bf16-appropriate tolerance).
    w1, b1, w2, b2, w3, b3 = params
    ref = jnp.maximum(x @ w1 + b1, 0.0)
    ref = jnp.maximum(ref @ w2 + b2, 0.0)
    ref = ref @ w3 + b3

    assert out.shape == (batch, action_size)
    assert jnp.allclose(out, ref, atol=5e-2, rtol=5e-2), (
        f"max abs err {jnp.max(jnp.abs(out - ref))}")

    print("KERNEL_OK")
</pallas_src>

<mosaic_0001>
module attributes {stable_mosaic.version = 11 : i64} {
  func.func @_dqn_kernel(%arg0: i32, %arg1: memref<8x16xbf16, #tpu.memory_space<vmem>>, %arg2: memref<16x128xbf16, #tpu.memory_space<vmem>>, %arg3: memref<1x128xf32, #tpu.memory_space<vmem>>, %arg4: memref<128x128xbf16, #tpu.memory_space<vmem>>, %arg5: memref<1x128xf32, #tpu.memory_space<vmem>>, %arg6: memref<128x128xbf16, #tpu.memory_space<vmem>>, %arg7: memref<1x128xf32, #tpu.memory_space<vmem>>, %arg8: memref<8x128xf32, #tpu.memory_space<vmem>>) attributes {dimension_semantics = [#tpu.dimension_semantics<parallel>], iteration_bounds = array<i64: 1>, scalar_prefetch = 0 : i64, scratch_operands = 0 : i64, tpu.core_type = #tpu.core_type<tc>, window_params = [{transform_indices = @transform_0, window_bounds = array<i64: 8, 16>}, {pipeline_mode = #tpu.pipeline_mode<synchronous>, transform_indices = @transform_1, window_bounds = array<i64: 16, 128>}, {pipeline_mode = #tpu.pipeline_mode<synchronous>, transform_indices = @transform_2, window_bounds = array<i64: 1, 128>}, {pipeline_mode = #tpu.pipeline_mode<synchronous>, transform_indices = @transform_3, window_bounds = array<i64: 128, 128>}, {pipeline_mode = #tpu.pipeline_mode<synchronous>, transform_indices = @transform_4, window_bounds = array<i64: 1, 128>}, {pipeline_mode = #tpu.pipeline_mode<synchronous>, transform_indices = @transform_5, window_bounds = array<i64: 128, 128>}, {pipeline_mode = #tpu.pipeline_mode<synchronous>, transform_indices = @transform_6, window_bounds = array<i64: 1, 128>}, {transform_indices = @transform_7, window_bounds = array<i64: 8, 128>}]} {
    %c0 = arith.constant 0 : index
    %c0_0 = arith.constant 0 : index
    %0 = vector.load %arg1[%c0, %c0_0] : memref<8x16xbf16, #tpu.memory_space<vmem>>, vector<8x16xbf16>
    %c0_1 = arith.constant 0 : index
    %c0_2 = arith.constant 0 : index
    %1 = vector.load %arg2[%c0_1, %c0_2] : memref<16x128xbf16, #tpu.memory_space<vmem>>, vector<16x128xbf16>
    %cst = arith.constant dense<0.000000e+00> : vector<8x128xf32>
    %2 = tpu.matmul %0, %1, %cst {dimension_numbers = #tpu.dot_dimension_numbers<[1], [0], [0], [1], [0, 0, 1, 1], [], []>} : vector<8x16xbf16>, vector<16x128xbf16>, vector<8x128xf32> -> vector<8x128xf32>
    %c0_3 = arith.constant 0 : index
    %c0_4 = arith.constant 0 : index
    %3 = vector.load %arg3[%c0_3, %c0_4] : memref<1x128xf32, #tpu.memory_space<vmem>>, vector<1x128xf32>
    %4 = vector.broadcast %3 : vector<1x128xf32> to vector<8x128xf32>
    %5 = arith.addf %2, %4 : vector<8x128xf32>
    %cst_5 = arith.constant 0.000000e+00 : f32
    %6 = vector.broadcast %cst_5 : f32 to vector<8x128xf32>
    %7 = arith.maximumf %5, %6 : vector<8x128xf32>
    %8 = arith.truncf %7 : vector<8x128xf32> to vector<8x128xbf16>
    %c0_6 = arith.constant 0 : index
    %c0_7 = arith.constant 0 : index
    %9 = vector.load %arg4[%c0_6, %c0_7] : memref<128x128xbf16, #tpu.memory_space<vmem>>, vector<128x128xbf16>
    %cst_8 = arith.constant dense<0.000000e+00> : vector<8x128xf32>
    %10 = tpu.matmul %8, %9, %cst_8 {dimension_numbers = #tpu.dot_dimension_numbers<[1], [0], [0], [1], [0, 0, 1, 1], [], []>} : vector<8x128xbf16>, vector<128x128xbf16>, vector<8x128xf32> -> vector<8x128xf32>
    %c0_9 = arith.constant 0 : index
    %c0_10 = arith.constant 0 : index
    %11 = vector.load %arg5[%c0_9, %c0_10] : memref<1x128xf32, #tpu.memory_space<vmem>>, vector<1x128xf32>
    %12 = vector.broadcast %11 : vector<1x128xf32> to vector<8x128xf32>
    %13 = arith.addf %10, %12 : vector<8x128xf32>
    %cst_11 = arith.constant 0.000000e+00 : f32
    %14 = vector.broadcast %cst_11 : f32 to vector<8x128xf32>
    %15 = arith.maximumf %13, %14 : vector<8x128xf32>
    %16 = arith.truncf %15 : vector<8x128xf32> to vector<8x128xbf16>
    %c0_12 = arith.constant 0 : index
    %c0_13 = arith.constant 0 : index
    %17 = vector.load %arg6[%c0_12, %c0_13] : memref<128x128xbf16, #tpu.memory_space<vmem>>, vector<128x128xbf16>
    %cst_14 = arith.constant dense<0.000000e+00> : vector<8x128xf32>
    %18 = tpu.matmul %16, %17, %cst_14 {dimension_numbers = #tpu.dot_dimension_numbers<[1], [0], [0], [1], [0, 0, 1, 1], [], []>} : vector<8x128xbf16>, vector<128x128xbf16>, vector<8x128xf32> -> vector<8x128xf32>
    %c0_15 = arith.constant 0 : index
    %c0_16 = arith.constant 0 : index
    %19 = vector.load %arg7[%c0_15, %c0_16] : memref<1x128xf32, #tpu.memory_space<vmem>>, vector<1x128xf32>
    %20 = vector.broadcast %19 : vector<1x128xf32> to vector<8x128xf32>
    %21 = arith.addf %18, %20 : vector<8x128xf32>
    %c0_17 = arith.constant 0 : index
    %c0_18 = arith.constant 0 : index
    %22 = vector.load %arg8[%c0_17, %c0_18] : memref<8x128xf32, #tpu.memory_space<vmem>>, vector<8x128xf32>
    tpu.vector_store %arg8[%c0_17, %c0_18], %21 {strides = array<i32>} : memref<8x128xf32, #tpu.memory_space<vmem>>, vector<8x128xf32>,
    return
  }
  func.func @transform_0(%arg0: i32) -> (i32, i32) {
    %c0_i32 = arith.constant 0 : i32
    %c0_i32_0 = arith.constant 0 : i32
    return %arg0, %c0_i32 : i32, i32
  }
  func.func @transform_1(%arg0: i32) -> (i32, i32) {
    %c0_i32 = arith.constant 0 : i32
    %c0_i32_0 = arith.constant 0 : i32
    %c0_i32_1 = arith.constant 0 : i32
    return %c0_i32, %c0_i32_0 : i32, i32
  }
  func.func @transform_2(%arg0: i32) -> (i32, i32) {
    %c0_i32 = arith.constant 0 : i32
    %c0_i32_0 = arith.constant 0 : i32
    %c0_i32_1 = arith.constant 0 : i32
    return %c0_i32, %c0_i32_0 : i32, i32
  }
  func.func @transform_3(%arg0: i32) -> (i32, i32) {
    %c0_i32 = arith.constant 0 : i32
    %c0_i32_0 = arith.constant 0 : i32
    %c0_i32_1 = arith.constant 0 : i32
    return %c0_i32, %c0_i32_0 : i32, i32
  }
  func.func @transform_4(%arg0: i32) -> (i32, i32) {
    %c0_i32 = arith.constant 0 : i32
    %c0_i32_0 = arith.constant 0 : i32
    %c0_i32_1 = arith.constant 0 : i32
    return %c0_i32, %c0_i32_0 : i32, i32
  }
  func.func @transform_5(%arg0: i32) -> (i32, i32) {
    %c0_i32 = arith.constant 0 : i32
    %c0_i32_0 = arith.constant 0 : i32
    %c0_i32_1 = arith.constant 0 : i32
    return %c0_i32, %c0_i32_0 : i32, i32
  }
  func.func @transform_6(%arg0: i32) -> (i32, i32) {
    %c0_i32 = arith.constant 0 : i32
    %c0_i32_0 = arith.constant 0 : i32
    %c0_i32_1 = arith.constant 0 : i32
    return %c0_i32, %c0_i32_0 : i32, i32
  }
  func.func @transform_7(%arg0: i32) -> (i32, i32) {
    %c0_i32 = arith.constant 0 : i32
    %c0_i32_0 = arith.constant 0 : i32
    return %arg0, %c0_i32 : i32, i32
  }
}

</mosaic_0001>

<bundles_post_ra>
// kernel: dqn_forward.1
= control target key start
LH: loop header
LB: loop body
LE: loop exit
PB: predicated region body
PF: predicated region fallthrough
CT: control target
= control target key end

     0   :  { %v424_v0 = vmov 0.0   ;;  %vm425_vm0 = vmmov 0   ;;  %vm43_vm1 = vcmask 130048   ;;  %s552_s1 = inlined_call_operand.vmem [shape: bf16[16,128], index: 1, kind: input, shape index: {}]   ;;  %s553_s0 = inlined_call_operand.vmem [shape: bf16[8,16], index: 0, kind: input, shape index: {}]   ;;  %s554_s3 = inlined_call_operand.vmem [shape: bf16[128,128], index: 3, kind: input, shape index: {}]   ;;  %s555_s5 = inlined_call_operand.vmem [shape: bf16[128,128], index: 5, kind: input, shape index: {}]   ;;  %s556_s2 = inlined_call_operand.vmem [shape: f32[1,128], index: 2, kind: input, shape index: {}]   ;;  %s557_s4 = inlined_call_operand.vmem [shape: f32[1,128], index: 4, kind: input, shape index: {}]   ;;  %s558_s6 = inlined_call_operand.vmem [shape: f32[1,128], index: 6, kind: input, shape index: {}]   ;;  %s559_s7 = inlined_call_operand.vmem [shape: f32[8,128], index: 7, kind: output, shape index: {}]  }
   0x1   :  { %359 = vmatprep.subr.bf16.mxu0 %v424_v0  ;;  %v407_v1 = vld [vmem:[%s552_s1] sm:$0xff]   ;;  %361 = vmatprep.mubr.msk.bf16.mxu0 %vm425_vm0, %v424_v0  ;;  %v409_v4 = vld [vmem:[%s554_s3 + $0x8] sm:$0xff]   ;;  %v410_v5 = vld [vmem:[%s554_s3 + $0x10] sm:$0xff]  }
   0x2   :  { %v27_v2 = vld [vmem:[%s553_s0] sm:$0xf]  ;;  %365 = vmatprep.subr.bf16.mxu1 %v424_v0  ;;  %381 = vmatprep.mubr.msk.bf16.mxu1 %vm425_vm0, %v424_v0  ;;  %v411_v6 = vld [vmem:[%s554_s3 + $0x18] sm:$0xff]   ;;  %v413_v8 = vld [vmem:[%s554_s3 + $0x28] sm:$0xff]  }
   0x3   :  { %360 = vmatpush3.bf16.msra.mxu0 %v407_v1  ;;  %v408_v3 = vld [vmem:[%s554_s3] sm:$0xff]   ;;  %v414_v9 = vld [vmem:[%s554_s3 + $0x30] sm:$0xff]   ;;  %v415_v10 = vld [vmem:[%s554_s3 + $0x38] sm:$0xff]  }
   0x4   :  { %385 = vmatprep.subr.bf16.mxu0 %v424_v0  ;;  %366 = vmatpush3.bf16.msra.mxu1 %v408_v3  ;;  %v412_v7 = vld [vmem:[%s554_s3 + $0x20] sm:$0xff]   ;;  %v417_v12 = vld [vmem:[%s555_s5 + $0x8] sm:$0xff]   ;;  %v418_v13 = vld [vmem:[%s555_s5 + $0x10] sm:$0xff]  }
   0x5   :  { %367 = vmatprep.subr.bf16.mxu1 %v424_v0  ;;  %v416_v11 = vld [vmem:[%s555_s5] sm:$0xff]   ;;  %v419_v14 = vld [vmem:[%s555_s5 + $0x18] sm:$0xff]   ;;  %v421_v16 = vld [vmem:[%s555_s5 + $0x28] sm:$0xff]  }
   0x6   :  { %362 = vmatmul.mubr.msk.bf16.vlgmr.msra.gmra.mrb[0].mxu0 %vm43_vm1, %v27_v2  ;;  %v420_v15 = vld [vmem:[%s555_s5 + $0x20] sm:$0xff]   ;;  %v422_v25 = vld [vmem:[%s555_s5 + $0x30] sm:$0xff]   ;;  %v423_v26 = vld [vmem:[%s555_s5 + $0x38] sm:$0xff]  }
   0x7   :  { %401 = vmatprep.mubr.msk.bf16.mxu0 %vm425_vm0, %v424_v0  ;;  %386 = vmatpush3.bf16.msra.mxu0 %v416_v11  ;;  %v318_v17 = vld [vmem:[%s556_s2] ss:$0 sm:$0xff] }
   0x8   :  { %368 = vmatpush3.bf16.msra.mxu1 %v409_v4  ;;  %387 = vmatprep.subr.bf16.mxu0 %v424_v0  ;;  %v321_v27 = vld [vmem:[%s557_s4] ss:$0 sm:$0xff] }
   0x9   :  { %369 = vmatprep.subr.bf16.mxu1 %v424_v0  ;;  %v330_v35 = vld [vmem:[%s558_s6] ss:$0 sm:$0xff] }
   0xb   :  { %388 = vmatpush3.bf16.msra.mxu0 %v417_v12 }
   0xc   :  { %370 = vmatpush3.bf16.msra.mxu1 %v410_v5  ;;  %389 = vmatprep.subr.bf16.mxu0 %v424_v0 }
   0xd   :  { %371 = vmatprep.subr.bf16.mxu1 %v424_v0 }
   0xf   :  { %390 = vmatpush3.bf16.msra.mxu0 %v418_v13 }
  0x10   :  { %372 = vmatpush3.bf16.msra.mxu1 %v411_v6  ;;  %391 = vmatprep.subr.bf16.mxu0 %v424_v0 }
  0x11   :  { %373 = vmatprep.subr.bf16.mxu1 %v424_v0 }
  0x13   :  { %392 = vmatpush3.bf16.msra.mxu0 %v419_v14 }
  0x14   :  { %374 = vmatpush3.bf16.msra.mxu1 %v412_v7  ;;  %393 = vmatprep.subr.bf16.mxu0 %v424_v0 }
  0x15   :  { %375 = vmatprep.subr.bf16.mxu1 %v424_v0 }
  0x17   :  { %394 = vmatpush3.bf16.msra.mxu0 %v420_v15 }
  0x18   :  { %376 = vmatpush3.bf16.msra.mxu1 %v413_v8  ;;  %395 = vmatprep.subr.bf16.mxu0 %v424_v0 }
  0x19   :  { %377 = vmatprep.subr.bf16.mxu1 %v424_v0 }
  0x1b   :  { %396 = vmatpush3.bf16.msra.mxu0 %v421_v16 }
  0x1c   :  { %378 = vmatpush3.bf16.msra.mxu1 %v414_v9  ;;  %397 = vmatprep.subr.bf16.mxu0 %v424_v0 }
  0x1d   :  { %379 = vmatprep.subr.bf16.mxu1 %v424_v0 }
  0x1f   :  { %398 = vmatpush3.bf16.msra.mxu0 %v422_v25 }
  0x20   :  { %380 = vmatpush3.bf16.msra.mxu1 %v415_v10  ;;  %399 = vmatprep.subr.bf16.mxu0 %v424_v0 }
  0x23   :  { %400 = vmatpush3.bf16.msra.mxu0 %v423_v26 }
  0xd9   :  { %v81_v18 = vpop.f32.mrb[0].mxu0 }
  0xda   :  { %v82_v19 = vadd.f32 %v318_v17, %v81_v18  ;;  %v363_v20 = vpop.f32.mrb[1].mxu0 }
  0xdb   :  { %v84_v21 = vpop.f32.mrb[2].mxu0 }
  0xdc   :  { %v87_v22 = vmax.f32 %v82_v19, 0.0  ;;  %v364_v23 = vpop.f32.mrb[3].mxu0 }
  0xde   :  { %v88_v24 = vpack.c.bf16 %v87_v22, %v87_v22 }
  0xe0   :  { %382 = vmatmul.mubr.bf16.vlgmr.msra.gmra.mrb[0].mxu1 %v88_v24 }
 0x1b3   :  { %v194_v28 = vpop.f32.mrb[0].mxu1 }
 0x1b4   :  { %v195_v29 = vadd.f32 %v321_v27, %v194_v28  ;;  %v383_v30 = vpop.f32.mrb[1].mxu1 }
 0x1b5   :  { %v197_v31 = vpop.f32.mrb[2].mxu1 }
 0x1b6   :  { %v200_v32 = vmax.f32 %v195_v29, 0.0  ;;  %v384_v33 = vpop.f32.mrb[3].mxu1 }
 0x1b8   :  { %v201_v34 = vpack.c.bf16 %v200_v32, %v200_v32 }
 0x1ba   :  { %402 = vmatmul.mubr.bf16.vlgmr.msra.gmra.mrb[4].mxu0 %v201_v34 }
 0x28d   :  { %v307_v36 = vpop.f32.mrb[4].mxu0 }
 0x28e   :  { %v308_v37 = vadd.f32 %v330_v35, %v307_v36  ;;  %v403_v38 = vpop.f32.mrb[5].mxu0 }
 0x28f   :  { %v310_v39 = vpop.f32.mrb[6].mxu0 }
 0x290   :  { %313 = vst [vmem:[%s559_s7] sm:$0xff] %v308_v37  ;;  %v404_v40 = vpop.f32.mrb[7].mxu0 }

</bundles_post_ra>
